<compile_context>
chip_gen: v5e
topology: v5e:2x2
jax: 0.10.0
libtpu: 0.0.40
codegen_flags: <defaults>
</compile_context>

<pallas_src>
import functools

import jax
import jax.numpy as jnp
from jax import lax
from jax.experimental import pallas as pl
from jax.experimental.pallas import tpu as pltpu


# ---------------------------------------------------------------------------
# Device-aware budgets (computed once at import; conservative fallbacks).
# ---------------------------------------------------------------------------
def _detect_vmem_capacity_bytes():
    try:
        info = pltpu.get_tpu_info()
        cap = getattr(info, "vmem_capacity_bytes", None)
        if cap:
            return int(cap)
    except Exception:
        pass
    try:
        kind = jax.devices()[0].device_kind.lower()
        if "v7" in kind:
            return 64 * 1024 * 1024
        if "v5 lite" in kind or "v5e" in kind or "v6" in kind:
            return 128 * 1024 * 1024
    except Exception:
        pass
    return 64 * 1024 * 1024                      # conservative (v7x-safe)


_VMEM_PHYS = _detect_vmem_capacity_bytes()
if _VMEM_PHYS >= 128 * 1024 * 1024:              # v5e / v6e: 128 MiB VMEM
    _VMEM_LIMIT_BYTES = 100 * 1024 * 1024
    _TARGET_BLOCK_BYTES = 12 * 1024 * 1024
else:                                            # v7x (64 MiB) or unknown
    _VMEM_LIMIT_BYTES = 48 * 1024 * 1024
    _TARGET_BLOCK_BYTES = 6 * 1024 * 1024

_MAX_LANE_TILE = 8192        # cap column tile -> at most 64 static 128-lane chunks


# ---------------------------------------------------------------------------
# Kernel 1: per-row sum / sum-of-squares (streamed over the column grid axis).
# 128-lane-wide partials live in VMEM scratch; the XLU fold to width 1 happens
# once per row block, on the final reduction step.
# ---------------------------------------------------------------------------
def _row_stats_kernel(x_ref, sum_ref, sq_ref, acc_s, acc_q):
    j = pl.program_id(1)

    @pl.when(j == 0)
    def _():
        acc_s[...] = jnp.zeros_like(acc_s)
        acc_q[...] = jnp.zeros_like(acc_q)

    xb = x_ref[...].astype(jnp.float32)              # (rblk, mblk)
    n_chunks = xb.shape[1] // 128                    # mblk is a multiple of 128
    s = acc_s[...]
    q = acc_q[...]
    for t in range(n_chunks):                        # static, unrolled
        c = xb[:, t * 128:(t + 1) * 128]
        s = s + c
        q = q + c * c
    acc_s[...] = s
    acc_q[...] = q

    @pl.when(j == pl.num_programs(1) - 1)
    def _():
        sum_ref[...] = jnp.sum(acc_s[...], axis=1, keepdims=True)
        sq_ref[...] = jnp.sum(acc_q[...], axis=1, keepdims=True)


# ---------------------------------------------------------------------------
# Kernel 2: elementwise normalize + affine, y = x * scale + shift (per row).
# ---------------------------------------------------------------------------
def _row_norm_kernel(x_ref, scale_ref, shift_ref, y_ref):
    xb = x_ref[...].astype(jnp.float32)
    y_ref[...] = (xb * scale_ref[...] + shift_ref[...]).astype(y_ref.dtype)


# ---------------------------------------------------------------------------
# Fused single-pass kernel: whole (G, chn, M) tensor resident in VMEM.
# ---------------------------------------------------------------------------
def _fused_kernel(x_ref, gamma_ref, beta_ref, y_ref, *, inv_count, eps):
    xb = x_ref[...].astype(jnp.float32)                          # (G, chn, M)
    s = jnp.sum(xb, axis=2, keepdims=True)                       # (G, chn, 1)
    s = jnp.sum(s, axis=0, keepdims=True)                        # (1, chn, 1)
    q = jnp.sum(xb * xb, axis=2, keepdims=True)
    q = jnp.sum(q, axis=0, keepdims=True)
    mean = s * inv_count
    var = jnp.maximum(q * inv_count - mean * mean, 0.0)          # biased var
    inv_std = lax.rsqrt(var + eps)
    scale = gamma_ref[...] * inv_std                             # (1, chn, 1)
    shift = beta_ref[...] - mean * scale
    y_ref[...] = (xb * scale + shift).astype(y_ref.dtype)


# ---------------------------------------------------------------------------
# Tiling helpers.
# ---------------------------------------------------------------------------
def _round_up(n, m):
    return ((n + m - 1) // m) * m


def _pick_tile(n, unit, cap):
    """Pick a tile (multiple of `unit`, <= cap) for a dim of size n.
    Returns (tile, n_padded). Prefers an exact divisor; otherwise pads n up to
    a multiple of a cap-sized tile (never above the budget, never degenerate)."""
    cap = max(unit, min(_round_up(n, unit), cap))
    cap -= cap % unit
    if n % unit == 0:
        floor = max(unit, (cap // 4) - ((cap // 4) % unit))
        t = cap
        while t >= floor:
            if n % t == 0:
                return t, n
            t -= unit
    return cap, _round_up(n, cap)


def _pick_tiles(R, M, itemsize):
    row_unit = max(8, 32 // itemsize)                    # 8 f32 / 16 bf16 / 32 i8
    elem_budget = max(row_unit * 128, _TARGET_BLOCK_BYTES // itemsize)
    m_cap = min(_MAX_LANE_TILE, max(128, elem_budget // row_unit))
    mblk, m_pad = _pick_tile(M, 128, m_cap)
    r_cap = max(row_unit, elem_budget // mblk)
    rblk, r_pad = _pick_tile(R, row_unit, r_cap)
    # v7x megacore: make sure the parallel (row) grid axis has >= 2 steps.
    if r_pad // rblk < 2:
        half = rblk // 2
        if half >= row_unit and half % row_unit == 0 and r_pad % half == 0:
            rblk = half
    return rblk, mblk, r_pad, m_pad


# ---------------------------------------------------------------------------
# RotBN forward.
# ---------------------------------------------------------------------------
@functools.partial(jax.jit, static_argnames=("chn", "eps", "force_two_pass"))
def rot_bn(x, gamma, beta, *, chn, eps=1e-5, force_two_pass=False):
    bs, c_total, H, W = x.shape
    n_rot = c_total // chn
    G = bs * n_rot
    R = G * chn                        # rows of the 2-D view; row = g*chn + c
    M = H * W
    count = G * H * W                  # elements pooled per channel
    itemsize = jnp.dtype(x.dtype).itemsize

    gamma_f = gamma.astype(jnp.float32)
    beta_f = beta.astype(jnp.float32)

    # -------- fused single-pass fast path: x resident in VMEM (2x traffic) ---
    fused_bytes_f32 = R * M * 4
    if (not force_two_pass) and fused_bytes_f32 * 6 <= _VMEM_LIMIT_BYTES:
        x3 = x.reshape(G, chn, M)                         # pure reshape
        y3 = pl.pallas_call(
            functools.partial(_fused_kernel,
                              inv_count=1.0 / float(count), eps=float(eps)),
            out_shape=jax.ShapeDtypeStruct((G, chn, M), x.dtype),
            in_specs=[
                pl.BlockSpec((G, chn, M), lambda: (0, 0, 0)),
                pl.BlockSpec((1, chn, 1), lambda: (0, 0, 0)),
                pl.BlockSpec((1, chn, 1), lambda: (0, 0, 0)),
            ],
            out_specs=pl.BlockSpec((G, chn, M), lambda: (0, 0, 0)),
            compiler_params=pltpu.CompilerParams(
                vmem_limit_bytes=_VMEM_LIMIT_BYTES),
        )(x3, gamma_f.reshape(1, chn, 1), beta_f.reshape(1, chn, 1))
        return y3.reshape(bs, c_total, H, W)

    # -------- streaming two-pass path ----------------------------------------
    x2d = x.reshape(R, M)                                 # pure reshape
    rblk, mblk, R_pad, M_pad = _pick_tiles(R, M, itemsize)
    if (R_pad, M_pad) != (R, M):
        # Zero padding is stats-exact: zeros add nothing to sum/sumsq and the
        # mean/var divide by the true `count`; padded outputs are sliced away.
        x2d = jnp.pad(x2d, ((0, R_pad - R), (0, M_pad - M)))
    grid = (R_pad // rblk, M_pad // mblk)

    # Pass 1: per-row sum / sum of squares.
    row_sum, row_sq = pl.pallas_call(
        _row_stats_kernel,
        out_shape=(
            jax.ShapeDtypeStruct((R_pad, 1), jnp.float32),
            jax.ShapeDtypeStruct((R_pad, 1), jnp.float32),
        ),
        grid_spec=pltpu.PrefetchScalarGridSpec(
            num_scalar_prefetch=0,
            grid=grid,
            in_specs=[pl.BlockSpec((rblk, mblk), lambda i, j: (i, j))],
            out_specs=(
                pl.BlockSpec((rblk, 1), lambda i, j: (i, 0)),
                pl.BlockSpec((rblk, 1), lambda i, j: (i, 0)),
            ),
            scratch_shapes=[
                pltpu.VMEM((rblk, 128), jnp.float32),
                pltpu.VMEM((rblk, 128), jnp.float32),
            ],
        ),
        compiler_params=pltpu.CompilerParams(
            dimension_semantics=("parallel", "arbitrary"),
            vmem_limit_bytes=_VMEM_LIMIT_BYTES,
        ),
    )(x2d)

    # Tiny glue: fold per-row stats -> per-channel scale/shift.
    ch_sum = row_sum[:R, 0].reshape(G, chn).sum(axis=0)
    ch_sq = row_sq[:R, 0].reshape(G, chn).sum(axis=0)
    mean = ch_sum / float(count)
    var = jnp.maximum(ch_sq / float(count) - mean * mean, 0.0)   # biased var
    inv_std = lax.rsqrt(var + eps)
    scale_c = gamma_f * inv_std
    shift_c = beta_f - mean * scale_c
    scale_rows = jnp.tile(scale_c, G).reshape(R, 1)
    shift_rows = jnp.tile(shift_c, G).reshape(R, 1)
    if R_pad != R:
        scale_rows = jnp.pad(scale_rows, ((0, R_pad - R), (0, 0)))
        shift_rows = jnp.pad(shift_rows, ((0, R_pad - R), (0, 0)))

    # Pass 2: y = x * scale + shift, lane-dense streaming output.
    y2d = pl.pallas_call(
        _row_norm_kernel,
        out_shape=jax.ShapeDtypeStruct((R_pad, M_pad), x.dtype),
        grid_spec=pltpu.PrefetchScalarGridSpec(
            num_scalar_prefetch=0,
            grid=grid,
            in_specs=[
                pl.BlockSpec((rblk, mblk), lambda i, j: (i, j)),
                pl.BlockSpec((rblk, 1), lambda i, j: (i, 0)),
                pl.BlockSpec((rblk, 1), lambda i, j: (i, 0)),
            ],
            out_specs=pl.BlockSpec((rblk, mblk), lambda i, j: (i, j)),
        ),
        compiler_params=pltpu.CompilerParams(
            dimension_semantics=("parallel", "parallel"),
            vmem_limit_bytes=_VMEM_LIMIT_BYTES,
        ),
    )(x2d, scale_rows, shift_rows)

    if (R_pad, M_pad) != (R, M):
        y2d = y2d[:R, :M]
    return y2d.reshape(bs, c_total, H, W)


if __name__ == "__main__":
    chn = 4
    n_rot = 2
    bs, H, W = 2, 16, 16
    eps = 1e-5

    key = jax.random.PRNGKey(0)
    x = jax.random.normal(key, (bs, n_rot * chn, H, W), dtype=jnp.float32)
    gamma = 1.0 + 0.1 * jnp.arange(chn, dtype=jnp.float32)
    beta = 0.05 * jnp.arange(chn, dtype=jnp.float32)

    # Pure-JAX reference of the same RotBN semantics.
    x5 = x.reshape(bs, n_rot, chn, H, W)
    xr = jnp.transpose(x5, (0, 2, 1, 3, 4)).reshape(bs, chn, n_rot * H, W)
    m = jnp.mean(xr, axis=(0, 2, 3), keepdims=True)
    v = jnp.mean((xr - m) ** 2, axis=(0, 2, 3), keepdims=True)
    ref = (xr - m) / jnp.sqrt(v + eps)
    ref = ref * gamma[None, :, None, None] + beta[None, :, None, None]
    ref = jnp.transpose(
        ref.reshape(bs, chn, n_rot, H, W), (0, 2, 1, 3, 4)
    ).reshape(bs, n_rot * chn, H, W)

    # Fused single-pass path (tensor fits in VMEM).
    y_fused = rot_bn(x, gamma, beta, chn=chn, eps=eps)
    jax.block_until_ready(y_fused)
    assert jnp.allclose(y_fused, ref, atol=1e-4, rtol=1e-4)

    # Streaming two-pass path (exercised explicitly).
    y_stream = rot_bn(x, gamma, beta, chn=chn, eps=eps, force_two_pass=True)
    jax.block_until_ready(y_stream)
    assert jnp.allclose(y_stream, ref, atol=1e-4, rtol=1e-4)

    print("KERNEL_OK")
</pallas_src>

<mosaic_0001>
module attributes {stable_mosaic.version = 11 : i64} {
  func.func @_fused_kernel(%arg0: memref<4x4x256xf32, #tpu.memory_space<vmem>>, %arg1: memref<1x4x1xf32, #tpu.memory_space<vmem>>, %arg2: memref<1x4x1xf32, #tpu.memory_space<vmem>>, %arg3: memref<4x4x256xf32, #tpu.memory_space<vmem>>) attributes {dimension_semantics = [], scalar_prefetch = 0 : i64, scratch_operands = 0 : i64, tpu.core_type = #tpu.core_type<tc>} {
    %c0 = arith.constant 0 : index
    %c0_0 = arith.constant 0 : index
    %c0_1 = arith.constant 0 : index
    %0 = vector.load %arg0[%c0, %c0_0, %c0_1] : memref<4x4x256xf32, #tpu.memory_space<vmem>>, vector<4x4x256xf32>
    %cst = arith.constant dense<0.000000e+00> : vector<4x4xf32>
    %1 = vector.multi_reduction <add>, %0, %cst [2] : vector<4x4x256xf32> to vector<4x4xf32>
    %2 = vector.shape_cast %1 : vector<4x4xf32> to vector<4x4x1xf32>
    %cst_2 = arith.constant dense<0.000000e+00> : vector<4x1xf32>
    %3 = vector.multi_reduction <add>, %2, %cst_2 [0] : vector<4x4x1xf32> to vector<4x1xf32>
    %4 = vector.shape_cast %3 : vector<4x1xf32> to vector<1x4x1xf32>
    %5 = arith.mulf %0, %0 : vector<4x4x256xf32>
    %cst_3 = arith.constant dense<0.000000e+00> : vector<4x4xf32>
    %6 = vector.multi_reduction <add>, %5, %cst_3 [2] : vector<4x4x256xf32> to vector<4x4xf32>
    %7 = vector.shape_cast %6 : vector<4x4xf32> to vector<4x4x1xf32>
    %cst_4 = arith.constant dense<0.000000e+00> : vector<4x1xf32>
    %8 = vector.multi_reduction <add>, %7, %cst_4 [0] : vector<4x4x1xf32> to vector<4x1xf32>
    %9 = vector.shape_cast %8 : vector<4x1xf32> to vector<1x4x1xf32>
    %cst_5 = arith.constant 9.765625E-4 : f32
    %10 = vector.broadcast %cst_5 : f32 to vector<1x4x1xf32>
    %11 = arith.mulf %4, %10 : vector<1x4x1xf32>
    %cst_6 = arith.constant 9.765625E-4 : f32
    %12 = vector.broadcast %cst_6 : f32 to vector<1x4x1xf32>
    %13 = arith.mulf %9, %12 : vector<1x4x1xf32>
    %14 = arith.mulf %11, %11 : vector<1x4x1xf32>
    %15 = arith.subf %13, %14 : vector<1x4x1xf32>
    %cst_7 = arith.constant 0.000000e+00 : f32
    %16 = vector.broadcast %cst_7 : f32 to vector<1x4x1xf32>
    %17 = arith.maximumf %15, %16 : vector<1x4x1xf32>
    %cst_8 = arith.constant 9.99999974E-6 : f32
    %18 = vector.broadcast %cst_8 : f32 to vector<1x4x1xf32>
    %19 = arith.addf %17, %18 : vector<1x4x1xf32>
    %20 = math.rsqrt %19 : vector<1x4x1xf32>
    %c0_9 = arith.constant 0 : index
    %c0_10 = arith.constant 0 : index
    %c0_11 = arith.constant 0 : index
    %21 = vector.load %arg1[%c0_9, %c0_10, %c0_11] : memref<1x4x1xf32, #tpu.memory_space<vmem>>, vector<1x4x1xf32>
    %22 = arith.mulf %21, %20 : vector<1x4x1xf32>
    %c0_12 = arith.constant 0 : index
    %c0_13 = arith.constant 0 : index
    %c0_14 = arith.constant 0 : index
    %23 = vector.load %arg2[%c0_12, %c0_13, %c0_14] : memref<1x4x1xf32, #tpu.memory_space<vmem>>, vector<1x4x1xf32>
    %24 = arith.mulf %11, %22 : vector<1x4x1xf32>
    %25 = arith.subf %23, %24 : vector<1x4x1xf32>
    %26 = vector.broadcast %22 : vector<1x4x1xf32> to vector<4x4x256xf32>
    %27 = arith.mulf %0, %26 : vector<4x4x256xf32>
    %28 = vector.broadcast %25 : vector<1x4x1xf32> to vector<4x4x256xf32>
    %29 = arith.addf %27, %28 : vector<4x4x256xf32>
    %c0_15 = arith.constant 0 : index
    %c0_16 = arith.constant 0 : index
    %c0_17 = arith.constant 0 : index
    %30 = vector.load %arg3[%c0_15, %c0_16, %c0_17] : memref<4x4x256xf32, #tpu.memory_space<vmem>>, vector<4x4x256xf32>
    tpu.vector_store %arg3[%c0_15, %c0_16, %c0_17], %29 {strides = array<i32>} : memref<4x4x256xf32, #tpu.memory_space<vmem>>, vector<4x4x256xf32>,
    return
  }
}

</mosaic_0001>

<bundles_post_ra>
// kernel: rot_bn.1
= control target key start
LH: loop header
LB: loop body
LE: loop exit
PB: predicated region body
PF: predicated region fallthrough
CT: control target
= control target key end

     0   :  { %vm45_vm0 = vcmask 1043456   ;;  %v192_v53 = vmov 0   ;;  %s292_s0 = inlined_call_operand.vmem [shape: f32[4,4,256], index: 0, kind: input, shape index: {}]   ;;  %s293_s1 = inlined_call_operand.vmem [shape: f32[1,4,1], index: 1, kind: input, shape index: {}]   ;;  %s294_s2 = inlined_call_operand.vmem [shape: f32[1,4,1], index: 2, kind: input, shape index: {}]   ;;  %s295_s3 = inlined_call_operand.vmem [shape: f32[4,4,256], index: 3, kind: output, shape index: {}]  }
   0x1   :  { %v217_v0 = vld [vmem:[%s292_s0 + $0x10] sm:$0xff]  ;;  %v222_v1 = vld [vmem:[%s292_s0 + $0x8] sm:$0xff]  ;;  %v227_v2 = vld [vmem:[%s292_s0] sm:$0xff]  ;;  %188 = vset.pattern.permute.xlu2 %v192_v53  ;;  %189 = vset.pattern.permute.xlu0 %v192_v53 }
   0x2   :  { %30 = vst [vmem:[#allocation1 + $0x20] ss:$2 sm:$0xff] %v217_v0  ;;  %v233_v3 = vld [vmem:[%s292_s0 + $0x18] sm:$0xff]  ;;  %v75_v4 = vmul.f32 %v217_v0, %v217_v0  ;;  %v74_v5 = vmul.f32 %v222_v1, %v222_v1  ;;  %v73_v10 = vmul.f32 %v227_v2, %v227_v2 }
   0x3   :  { %26 = vst [vmem:[#allocation1 + $0x10] ss:$2 sm:$0xff] %v222_v1  ;;  %v76_v15 = vmul.f32 %v233_v3, %v233_v3 }
   0x4   :  { %22 = vst [vmem:[#allocation1] ss:$2 sm:$0xff] %v227_v2 }
   0x5   :  { %34 = vst [vmem:[#allocation1 + $0x30] ss:$2 sm:$0xff] %v233_v3 }
   0x9   :  { %v31_v6 = vld.sshfl [vmem:[#allocation1 + $0x20] sm:$0xff pattern:$0x75316420]  ;;  %v32_v7 = vld.sshfl [vmem:[#allocation1 + $0x28] sm:$0xff pattern:$0x75316420] }
   0xa   :  { %v56_v8 = vsel %vm45_vm0, %v31_v6, 0.0  ;;  %v57_v9 = vsel %vm45_vm0, %v32_v7, 0.0  ;;  %89 = vst [vmem:[#allocation1 + $0x20] ss:$2 sm:$0xff] %v75_v4 }
   0xb   :  { %v58_v11 = vadd.f32 %v57_v9, %v56_v8  ;;  %v27_v12 = vld.sshfl [vmem:[#allocation1 + $0x10] sm:$0xff pattern:$0x75316420]  ;;  %v28_v13 = vld.sshfl [vmem:[#allocation1 + $0x18] sm:$0xff pattern:$0x75316420] }
   0xc   :  { %85 = vst [vmem:[#allocation1 + $0x10] ss:$2 sm:$0xff] %v74_v5  ;;  %v23_v14 = vld.sshfl [vmem:[#allocation1] sm:$0xff pattern:$0x75316420]  ;;  %v51_v22 = vsel %vm45_vm0, %v27_v12, 0.0 }
   0xd   :  { %59 = vadd.xlane.f32.xlu1 %v58_v11  ;;  %v24_v16 = vld.sshfl [vmem:[#allocation1 + $0x8] sm:$0xff pattern:$0x75316420]  ;;  %v46_v17 = vsel %vm45_vm0, %v23_v14, 0.0  ;;  %v52_v23 = vsel %vm45_vm0, %v28_v13, 0.0 }
   0xe   :  { %v47_v18 = vsel %vm45_vm0, %v24_v16, 0.0  ;;  %81 = vst [vmem:[#allocation1] ss:$2 sm:$0xff] %v73_v10  ;;  %v35_v19 = vld.sshfl [vmem:[#allocation1 + $0x30] sm:$0xff pattern:$0x75316420]  ;;  %v53_v31 = vadd.f32 %v52_v23, %v51_v22 }
   0xf   :  { %v48_v20 = vadd.f32 %v47_v18, %v46_v17  ;;  %v36_v21 = vld.sshfl [vmem:[#allocation1 + $0x38] sm:$0xff pattern:$0x75316420]  ;;  %v61_v39 = vsel %vm45_vm0, %v35_v19, 0.0  ;;  %v147_v23 = vld [vmem:[%s293_s1] sm:$0xf] }
  0x10   :  { %93 = vst [vmem:[#allocation1 + $0x30] ss:$2 sm:$0xff] %v76_v15  ;;  %v62_v40 = vsel %vm45_vm0, %v36_v21, 0.0 }
  0x11   :  { %49 = vadd.xlane.f32.xlu0 %v48_v20  ;;  %v90_v32 = vld.sshfl [vmem:[#allocation1 + $0x20] sm:$0xff pattern:$0x75316420]  ;;  %v91_v35 = vld.sshfl [vmem:[#allocation1 + $0x28] sm:$0xff pattern:$0x75316420]  ;;  %v63_v45 = vadd.f32 %v62_v40, %v61_v39 }
  0x12   :  { %v114_v41 = vsel %vm45_vm0, %v90_v32, 0.0  ;;  %v115_v42 = vsel %vm45_vm0, %v91_v35, 0.0 }
  0x13   :  { %v86_v24 = vld.sshfl [vmem:[#allocation1 + $0x10] sm:$0xff pattern:$0x75316420]  ;;  %v87_v25 = vld.sshfl [vmem:[#allocation1 + $0x18] sm:$0xff pattern:$0x75316420]  ;;  %v116_v46 = vadd.f32 %v115_v42, %v114_v41 }
  0x14   :  { %v109_v26 = vsel %vm45_vm0, %v86_v24, 0.0  ;;  %v110_v27 = vsel %vm45_vm0, %v87_v25, 0.0 }
  0x15   :  { %v111_v28 = vadd.f32 %v110_v27, %v109_v26  ;;  %v82_v29 = vld.sshfl [vmem:[#allocation1] sm:$0xff pattern:$0x75316420]  ;;  %v83_v30 = vld.sshfl [vmem:[#allocation1 + $0x8] sm:$0xff pattern:$0x75316420] }
  0x16   :  { %v104_v33 = vsel %vm45_vm0, %v82_v29, 0.0  ;;  %v105_v34 = vsel %vm45_vm0, %v83_v30, 0.0  ;;  %v149_v26 = vld [vmem:[%s294_s2] sm:$0xf]  ;;  %v193_v29 = vmov 839922192  }
  0x17   :  { %112 = vadd.xlane.f32.xlu2 %v111_v28  ;;  %v106_v36 = vadd.f32 %v105_v34, %v104_v33  ;;  %v94_v37 = vld.sshfl [vmem:[#allocation1 + $0x30] sm:$0xff pattern:$0x75316420]  ;;  %v95_v38 = vld.sshfl [vmem:[#allocation1 + $0x38] sm:$0xff pattern:$0x75316420]  ;;  %v157_v30 = vunpack.c.l.s4 %v193_v29 }
  0x18   :  { %v119_v43 = vsel %vm45_vm0, %v94_v37, 0.0  ;;  %v120_v44 = vsel %vm45_vm0, %v95_v38, 0.0 }
  0x19   :  { %107 = vadd.xlane.f32.xlu1 %v106_v36  ;;  %54 = vadd.xlane.f32.xlu0 %v53_v31  ;;  %v121_v47 = vadd.f32 %v120_v44, %v119_v43  ;;  %v158_v31 = vunpack.c.0.s8 %v157_v30 }
  0x1f   :  { %64 = vadd.xlane.f32.xlu2 %v63_v45 }
  0x21   :  { %117 = vadd.xlane.f32.xlu0 %v116_v46  ;;  %122 = vadd.xlane.f32.xlu1 %v121_v47 }
  0x80   :  { %v60_v48 = vpop.xlane.xlu1 %59 }
  0x81   :  { %v69_v57 = vsel %vm45_vm0, %v60_v48, 0.0 }
  0x84   :  { %v50_v49 = vpop.xlane.xlu0 %49 }
  0x85   :  { %v66_v54 = vsel %vm45_vm0, %v50_v49, 0.0 }
  0x8a   :  { %v113_v50 = vpop.xlane.xlu2 %112 }
  0x8b   :  { %v125_v58 = vsel %vm45_vm0, %v113_v50, 0.0 }
  0x8c   :  { %v108_v51 = vpop.xlane.xlu1 %107  ;;  %v55_v52 = vpop.xlane.xlu0 %54 }
  0x8d   :  { %v67_v55 = vsel %vm45_vm0, %v55_v52, 0.0  ;;  %v124_v59 = vsel %vm45_vm0, %v108_v51, 0.0 }
  0x8e   :  { %v68_v56 = vadd.f32 %v67_v55, %v66_v54  ;;  %v126_v63 = vadd.f32 %v125_v58, %v124_v59 }
  0x90   :  { %v70_v61 = vadd.f32 %v69_v57, %v68_v56 }
  0x92   :  { %v65_v60 = vpop.xlane.xlu2 %64 }
  0x93   :  { %v71_v62 = vsel %vm45_vm0, %v65_v60, 0.0 }
  0x94   :  { %v72_v4 = vadd.f32 %v71_v62, %v70_v61  ;;  %v118_v5 = vpop.xlane.xlu0 %117  ;;  %v123_v6 = vpop.xlane.xlu1 %122 }
  0x95   :  { %v127_v7 = vsel %vm45_vm0, %v118_v5, 0.0  ;;  %v129_v8 = vsel %vm45_vm0, %v123_v6, 0.0 }
  0x96   :  { %v131_v9 = vmul.f32 0.0009765625, %v72_v4  ;;  %v128_v10 = vadd.f32 %v127_v7, %v126_v63 }
  0x98   :  { %v133_v11 = vmul.f32 %v131_v9, %v131_v9  ;;  %v130_v12 = vadd.f32 %v129_v8, %v128_v10 }
  0x9a   :  { %v132_v13 = vmul.f32 0.0009765625, %v130_v12 }
  0x9c   :  { %v134_v14 = vsub.f32 %v132_v13, %v133_v11 }
  0x9e   :  { %v135_v15 = vmax.f32 %v134_v14, 0.0 }
  0xa0   :  { %v136_v16 = vadd.f32 1e-05, %v135_v15 }
  0xa2   :  { %190 = vrsqrt.f32 %v136_v16  ;;  %vm143_vm2 = vweird.f32 %v136_v16 }
  0xa8   :  { %v191_v17 = vpop.eup %190 }
  0xa9   :  { %v138_v18 = vmul.f32 %v191_v17, %v136_v16  ;;  %vm144_vm1 = vweird.f32 %v191_v17 }
  0xaa   :  { %vm145_vm3 = vmor %vm143_vm2, %vm144_vm1 }
  0xab   :  { %v139_v19 = vmul.f32 %v191_v17, %v138_v18 }
  0xad   :  { %v140_v20 = vmul.f32 0.5, %v139_v19 }
  0xaf   :  { %v141_v21 = vsub.f32 1.5, %v140_v20 }
  0xb1   :  { %v142_v22 = vmul.f32 %v191_v17, %v141_v21 }
  0xb3   :  { %v146_v24 = vsel %vm145_vm3, %v191_v17, %v142_v22 }
  0xb4   :  { %v148_v25 = vmul.f32 %v147_v23, %v146_v24 }
  0xb6   :  { %154 = vperm.xlu2 %188, %v148_v25   ;;  %v150_v27 = vmul.f32 %v148_v25, %v131_v9 }
  0xb8   :  { %v151_v28 = vsub.f32 %v149_v26, %v150_v27 }
  0xba   :  { %167 = vperm.xlu0 %189, %v151_v28  }
 0x110   :  { %v155_v32 = vpop.permute.xlu2 %154 }
 0x111   :  { %v159_v33 = vperm.slane %v155_v32, %v158_v31 }
 0x113   :  { %v161_v35 = vmul.f32 %v159_v33, %v227_v2  ;;  %v162_v36 = vmul.f32 %v159_v33, %v222_v1  ;;  %v163_v37 = vmul.f32 %v159_v33, %v217_v0  ;;  %v164_v39 = vmul.f32 %v159_v33, %v233_v3 }
 0x12c   :  { %v168_v34 = vpop.permute.xlu0 %167 }
 0x12d   :  { %v172_v38 = vperm.slane %v168_v34, %v158_v31 }
 0x12f   :  { %v174_v40 = vadd.f32 %v172_v38, %v161_v35  ;;  %v175_v41 = vadd.f32 %v172_v38, %v162_v36  ;;  %v176_v42 = vadd.f32 %v172_v38, %v163_v37  ;;  %v177_v43 = vadd.f32 %v172_v38, %v164_v39 }
 0x131   :  { %178 = vst [vmem:[%s295_s3] sm:$0xff] %v174_v40 }
 0x132   :  { %179 = vst [vmem:[%s295_s3 + $0x8] sm:$0xff] %v175_v41 }
 0x133   :  { %180 = vst [vmem:[%s295_s3 + $0x10] sm:$0xff] %v176_v42 }
 0x134   :  { %181 = vst [vmem:[%s295_s3 + $0x18] sm:$0xff] %v177_v43 }

</bundles_post_ra>
